<compile_context>
chip_gen: v5e
topology: v5e:2x2
jax: 0.10.0
libtpu: 0.0.40
codegen_flags: <defaults>
</compile_context>

<pallas_src>
import numpy as np
import jax
import jax.numpy as jnp
from jax.experimental import pallas as pl
from jax.experimental.pallas import tpu as pltpu


# ----------------------------------------------------------------------------
# small tiling helpers (trace-time Python only)
# ----------------------------------------------------------------------------
def _largest_divisor_tile(n, base, cap):
    """Largest d <= min(cap, n), multiple of `base`, dividing n. None if none."""
    d = (min(cap, n) // base) * base
    while d >= base:
        if n % d == 0:
            return d
        d -= base
    return None


def _pick_norm_layout(bc, hw, cap=4096):
    """Pick lane width L (multiple of 128, divides hw, <= cap); prefer a row
    count bc*hw//L that is a multiple of 8 (full sublane use)."""
    cands = []
    d = (min(cap, hw) // 128) * 128
    while d >= 128:
        if hw % d == 0:
            cands.append(d)
        d -= 128
    if not cands:
        # TODO(synk): odd H*W with no 128-multiple divisor falls back to one
        # full-width block per row (only hit for non-divisibility-padded inputs).
        return hw, bc
    for lane in cands:                      # cands is descending
        rows = bc * hw // lane
        if rows % 8 == 0:
            return lane, rows
    lane = cands[0]
    return lane, bc * hw // lane


def _pick_row_tile(rows, lane_width, target_bytes=2 << 20):
    """Largest multiple-of-8 divisor of `rows` keeping a block ~target_bytes."""
    cap = max(8, target_bytes // (4 * lane_width))
    t = min(rows, cap)
    t -= t % 8
    while t >= 8:
        if rows % t == 0:
            return t
        t -= 8
    return rows                             # full extent (allowed by BlockSpec)


# ----------------------------------------------------------------------------
# Kernel 1: pixel normalization  (x - pixel_mean) / pixel_std
#   laid out as a lane-dense (R, L) slab, fused as x * (1/std) + (-mean/std)
# ----------------------------------------------------------------------------
def _normalize_kernel(x_ref, off_ref, scale_ref, o_ref):
    o_ref[...] = x_ref[...] * scale_ref[...] + off_ref[...]


def normalize_images(images, pixel_mean, pixel_std):
    """images: (B, C, H, W) float32;  pixel_mean/std: (C,)"""
    B, C, H, W = images.shape
    HW = H * W
    L, R = _pick_norm_layout(B * C, HW)               # lane width, row count
    rows_per_chan = HW // L                           # rows per (b, c) plane

    x2d = images.reshape(R, L)
    mean_row = jnp.tile(jnp.repeat(pixel_mean, rows_per_chan), B)   # (R,)
    std_row = jnp.tile(jnp.repeat(pixel_std, rows_per_chan), B)     # (R,)
    scale = (1.0 / std_row).reshape(R, 1).astype(jnp.float32)
    offset = (-mean_row / std_row).reshape(R, 1).astype(jnp.float32)

    TR = _pick_row_tile(R, L)
    out = pl.pallas_call(
        _normalize_kernel,
        out_shape=jax.ShapeDtypeStruct((R, L), jnp.float32),
        grid=(R // TR,),
        in_specs=[
            pl.BlockSpec((TR, L), lambda i: (i, 0)),
            pl.BlockSpec((TR, 1), lambda i: (i, 0)),
            pl.BlockSpec((TR, 1), lambda i: (i, 0)),
        ],
        out_specs=pl.BlockSpec((TR, L), lambda i: (i, 0)),
        compiler_params=pltpu.CompilerParams(dimension_semantics=("parallel",)),
    )(x2d, offset, scale)
    return out.reshape(B, C, H, W)


# ----------------------------------------------------------------------------
# Kernel 2: mask logits  einsum('bqc,nc->bqn', mask_emb, ov_classifier_weight)
#   collapsed to a single (B*Q, C) @ (C, N) matmul; classifier pre-transposed
#   and logit-scale folded in by the caller.
# ----------------------------------------------------------------------------
def _mask_logits_kernel(emb_ref, w_ref, o_ref):
    o_ref[...] = jnp.dot(emb_ref[...], w_ref[...],
                         preferred_element_type=jnp.float32)


def mask_logits(mask_emb, classifier_weight_t):
    """mask_emb: (B, Q, C);  classifier_weight_t: (C, N) (logit-scaled)."""
    B, Q, C = mask_emb.shape
    N = classifier_weight_t.shape[1]
    emb2d = mask_emb.reshape(B * Q, C)
    tn = _largest_divisor_tile(N, 128, 2048) or N     # tile N only if lane-aligned
    out = pl.pallas_call(
        _mask_logits_kernel,
        out_shape=jax.ShapeDtypeStruct((B * Q, N), jnp.float32),
        grid=(N // tn,),
        in_specs=[
            pl.BlockSpec((B * Q, C), lambda j: (0, 0)),
            pl.BlockSpec((C, tn), lambda j: (0, j)),
        ],
        out_specs=pl.BlockSpec((B * Q, tn), lambda j: (0, j)),
        compiler_params=pltpu.CompilerParams(dimension_semantics=("parallel",)),
    )(emb2d, classifier_weight_t)
    return out.reshape(B, Q, N)


# ----------------------------------------------------------------------------
# Kernel 3: semantic_inference
#   p = softmax(mask_cls, -1)[..., :-1]   (hoisted outside, tiny)
#   s = sigmoid(mask_pred)                (in-kernel, streamed over H*W tiles)
#   semseg = einsum('qc,qhw->chw', p, s)  -> (N-1, T_HW) lane-dense output
# ----------------------------------------------------------------------------
def _semantic_inference_kernel(probs_ref, pred_ref, o_ref):
    # probs_ref: (1, N-1, Q) bf16 ; pred_ref: (1, Q, T) f32 ; o_ref: (1, N-1, T) f32
    masks = jax.nn.sigmoid(pred_ref[0])               # f32 elementwise (EUP)
    o_ref[0] = jnp.dot(probs_ref[0], masks.astype(jnp.bfloat16),
                       preferred_element_type=jnp.float32)


def semantic_inference(mask_cls, mask_pred):
    """mask_cls: (B, Q, N);  mask_pred: (B, Q, H, W) -> (B, N-1, H, W)."""
    B, Q, N = mask_cls.shape
    H, W = mask_pred.shape[-2:]
    HW = H * W

    # softmax over classes + drop "no object" class, transposed to (B, N-1, Q).
    # This is O(B*Q*N) — negligible — so compute once instead of per H*W tile.
    probs = jax.nn.softmax(mask_cls, axis=-1)[..., : N - 1]
    probs_t = jnp.swapaxes(probs, 1, 2).astype(jnp.bfloat16)   # (B, N-1, Q)

    pred3d = mask_pred.reshape(B, Q, HW)
    t_hw = _largest_divisor_tile(HW, 128, 2048) or HW

    out = pl.pallas_call(
        _semantic_inference_kernel,
        out_shape=jax.ShapeDtypeStruct((B, N - 1, HW), jnp.float32),
        grid=(B, HW // t_hw),
        in_specs=[
            pl.BlockSpec((1, N - 1, Q), lambda b, j: (b, 0, 0)),
            pl.BlockSpec((1, Q, t_hw), lambda b, j: (b, 0, j)),
        ],
        out_specs=pl.BlockSpec((1, N - 1, t_hw), lambda b, j: (b, 0, j)),
        compiler_params=pltpu.CompilerParams(
            dimension_semantics=("parallel", "parallel")),
    )(probs_t, pred3d)
    return out.reshape(B, N - 1, H, W)


# ----------------------------------------------------------------------------
# Deterministic stubs for external sub-modules (not defined in the SAN source)
# ----------------------------------------------------------------------------
def make_params(key, *, embed_dim=32, num_queries=8, num_classes=16,
                num_heads=4, patch=8):
    ks = jax.random.split(key, 6)
    classifier = jax.random.normal(ks[5], (num_classes, embed_dim), jnp.float32)
    classifier = classifier / jnp.linalg.norm(classifier, axis=-1, keepdims=True)
    return {
        "patch_embed_w": 0.02 * jax.random.normal(ks[0], (3 * patch * patch, embed_dim), jnp.float32),
        "query_embed":   0.02 * jax.random.normal(ks[1], (num_queries, embed_dim), jnp.float32),
        "attn_bias_w":   0.02 * jax.random.normal(ks[2], (num_heads, embed_dim, embed_dim), jnp.float32),
        "mask_proj_w":   0.02 * jax.random.normal(ks[3], (embed_dim, embed_dim), jnp.float32),
        "rec_proj_w":    0.02 * jax.random.normal(ks[4], (embed_dim, embed_dim), jnp.float32),
        "classifier":    classifier,
        "logit_scale":   jnp.float32(np.log(1.0 / 0.07)),
        "patch":         patch,
    }


def clip_visual_extractor(params, clip_input):
    # TODO(synk): real CLIP ViT FeatureExtractor is an external module; deterministic patch-embed stub.
    p = params["patch"]
    B, C, H, W = clip_input.shape
    hp, wp = H // p, W // p
    x = clip_input.reshape(B, C, hp, p, wp, p)
    x = jnp.transpose(x, (0, 2, 4, 1, 3, 5)).reshape(B, hp * wp, C * p * p)
    return x @ params["patch_embed_w"]                    # (B, L, D)


def side_adapter_network(params, images, clip_features, *, num_stages=2, mask_hw=8):
    # TODO(synk): side adapter network (ViT + heads) is an external module; deterministic stub.
    B, L, D = clip_features.shape
    q = params["query_embed"]                             # (Q, D)
    feat = clip_features @ params["mask_proj_w"]          # (B, L, D)
    hp = int(np.sqrt(L))
    mask_low = jnp.einsum("qd,bld->bql", q, feat).reshape(B, -1, hp, hp)
    mask_pred = jax.image.resize(mask_low, (B, mask_low.shape[1], mask_hw, mask_hw), "bilinear")
    attn_bias = jnp.einsum("qd,hde,ble->bhql", q, params["attn_bias_w"], clip_features)
    mask_preds = [mask_pred * (0.5 * (i + 1)) for i in range(num_stages)]
    attn_biases = [attn_bias * (0.5 * (i + 1)) for i in range(num_stages)]
    return mask_preds, attn_biases


def clip_rec_head(params, clip_features, attn_bias, normalize=True):
    # TODO(synk): RecWithAttnbiasHead (deeper CLIP layers w/ attention bias) is external; attention-pool stub.
    attn = jax.nn.softmax(attn_bias.mean(axis=1), axis=-1)        # (B, Q, L)
    emb = jnp.einsum("bql,bld->bqd", attn, clip_features @ params["rec_proj_w"])
    if normalize:
        emb = emb / (jnp.linalg.norm(emb, axis=-1, keepdims=True) + 1e-6)
    return emb


# ----------------------------------------------------------------------------
# SAN forward (inference path)
# ----------------------------------------------------------------------------
def san_forward(params, images_raw):
    """images_raw: (B, 3, H, W) float32 in [0, 255] (NCHW)."""
    pixel_mean = jnp.array([0.48145466, 0.4578275, 0.40821073], jnp.float32) * 255.0
    pixel_std = jnp.array([0.26862954, 0.26130258, 0.27577711], jnp.float32) * 255.0

    # (x - pixel_mean) / pixel_std   -- Pallas kernel (tiled, lane-dense)
    images = normalize_images(images_raw, pixel_mean, pixel_std)
    B, C, H, W = images.shape

    # asymetric_input=True, clip_resolution=0.5 (F.interpolate bilinear)
    clip_input = jax.image.resize(images, (B, C, H // 2, W // 2), "bilinear")

    clip_features = clip_visual_extractor(params, clip_input)
    mask_preds, attn_biases = side_adapter_network(params, images, clip_features)
    mask_embs = [clip_rec_head(params, clip_features, ab, normalize=True)
                 for ab in attn_biases]

    # ov_classifier_weight = logit_scale.exp() * classifier  (folded + transposed)
    ov_w_t = (jnp.exp(params["logit_scale"]) * params["classifier"]).T    # (C, N)

    # einsum('bqc,nc->bqn')   -- single fused Pallas matmul per stage
    mask_logits_list = [mask_logits(emb, ov_w_t) for emb in mask_embs]

    # inference branch: take last stage, upsample masks to padded image size
    last_pred = mask_preds[-1]
    last_logits = mask_logits_list[-1]
    last_pred = jax.image.resize(last_pred, (B, last_pred.shape[1], H, W), "bilinear")

    # semantic_inference   -- Pallas kernel (H*W-tiled, softmax hoisted)
    semseg = semantic_inference(last_logits, last_pred)               # (B, N-1, H, W)
    # TODO(synk): sem_seg_postprocess crop/resize is identity here (no padding, out size == in size).
    return semseg


# ----------------------------------------------------------------------------
# main: run forward + light per-kernel correctness checks
# ----------------------------------------------------------------------------
if __name__ == "__main__":
    key = jax.random.PRNGKey(0)
    k_img, k_par, k_emb, k_cls, k_prd = jax.random.split(key, 5)

    B, C, H, W = 2, 3, 32, 32
    images = jax.random.uniform(k_img, (B, C, H, W), jnp.float32) * 255.0
    params = make_params(k_par, embed_dim=32, num_queries=8, num_classes=16,
                         num_heads=4, patch=8)

    # full forward
    out = san_forward(params, images)
    out = jax.block_until_ready(out)
    assert out.shape == (B, 15, H, W) and out.dtype == jnp.float32
    assert bool(jnp.all(jnp.isfinite(out)))

    # --- per-kernel checks against pure-JAX references (loose tolerances) ----
    hi = jax.lax.Precision.HIGHEST

    pm = jnp.array([0.48145466, 0.4578275, 0.40821073], jnp.float32) * 255.0
    ps = jnp.array([0.26862954, 0.26130258, 0.27577711], jnp.float32) * 255.0
    norm_k = normalize_images(images, pm, ps)
    norm_r = (images - pm.reshape(1, C, 1, 1)) / ps.reshape(1, C, 1, 1)
    assert bool(jnp.allclose(norm_k, norm_r, rtol=1e-4, atol=1e-3))

    Q, D, N = 8, 32, 16
    emb = jax.random.normal(k_emb, (B, Q, D), jnp.float32)
    emb = emb / jnp.linalg.norm(emb, axis=-1, keepdims=True)
    ov_w_t = (jnp.exp(params["logit_scale"]) * params["classifier"]).T   # (D, N)
    ml_k = mask_logits(emb, ov_w_t)
    ml_r = jnp.einsum("bqc,cn->bqn", emb, ov_w_t, precision=hi)
    assert bool(jnp.allclose(ml_k, ml_r, rtol=2e-2, atol=3e-1))

    cls = jax.random.normal(k_cls, (B, Q, N), jnp.float32)
    prd = jax.random.normal(k_prd, (B, Q, H, W), jnp.float32)
    ss_k = semantic_inference(cls, prd)
    probs_r = jax.nn.softmax(cls, axis=-1)[..., : N - 1]
    ss_r = jnp.einsum("bqc,bqhw->bchw", probs_r, jax.nn.sigmoid(prd), precision=hi)
    assert bool(jnp.allclose(ss_k, ss_r, rtol=5e-2, atol=8e-2))          # bf16 dot

    print("KERNEL_OK")
</pallas_src>

<mosaic_0001>
module attributes {stable_mosaic.version = 11 : i64} {
  func.func @_normalize_kernel(%arg0: i32, %arg1: memref<24x256xf32, #tpu.memory_space<vmem>>, %arg2: memref<24x1xf32, #tpu.memory_space<vmem>>, %arg3: memref<24x1xf32, #tpu.memory_space<vmem>>, %arg4: memref<24x256xf32, #tpu.memory_space<vmem>>) attributes {dimension_semantics = [#tpu.dimension_semantics<parallel>], iteration_bounds = array<i64: 1>, scalar_prefetch = 0 : i64, scratch_operands = 0 : i64, tpu.core_type = #tpu.core_type<tc>, window_params = [{transform_indices = @transform_0, window_bounds = array<i64: 24, 256>}, {transform_indices = @transform_1, window_bounds = array<i64: 24, 1>}, {transform_indices = @transform_2, window_bounds = array<i64: 24, 1>}, {transform_indices = @transform_3, window_bounds = array<i64: 24, 256>}]} {
    %c0 = arith.constant 0 : index
    %c0_0 = arith.constant 0 : index
    %0 = vector.load %arg1[%c0, %c0_0] : memref<24x256xf32, #tpu.memory_space<vmem>>, vector<24x256xf32>
    %c0_1 = arith.constant 0 : index
    %c0_2 = arith.constant 0 : index
    %1 = vector.load %arg3[%c0_1, %c0_2] : memref<24x1xf32, #tpu.memory_space<vmem>>, vector<24x1xf32>
    %2 = vector.broadcast %1 : vector<24x1xf32> to vector<24x256xf32>
    %3 = arith.mulf %0, %2 : vector<24x256xf32>
    %c0_3 = arith.constant 0 : index
    %c0_4 = arith.constant 0 : index
    %4 = vector.load %arg2[%c0_3, %c0_4] : memref<24x1xf32, #tpu.memory_space<vmem>>, vector<24x1xf32>
    %5 = vector.broadcast %4 : vector<24x1xf32> to vector<24x256xf32>
    %6 = arith.addf %3, %5 : vector<24x256xf32>
    %c0_5 = arith.constant 0 : index
    %c0_6 = arith.constant 0 : index
    %7 = vector.load %arg4[%c0_5, %c0_6] : memref<24x256xf32, #tpu.memory_space<vmem>>, vector<24x256xf32>
    tpu.vector_store %arg4[%c0_5, %c0_6], %6 {strides = array<i32>} : memref<24x256xf32, #tpu.memory_space<vmem>>, vector<24x256xf32>,
    return
  }
  func.func @transform_0(%arg0: i32) -> (i32, i32) {
    %c0_i32 = arith.constant 0 : i32
    %c0_i32_0 = arith.constant 0 : i32
    return %arg0, %c0_i32 : i32, i32
  }
  func.func @transform_1(%arg0: i32) -> (i32, i32) {
    %c0_i32 = arith.constant 0 : i32
    %c0_i32_0 = arith.constant 0 : i32
    return %arg0, %c0_i32 : i32, i32
  }
  func.func @transform_2(%arg0: i32) -> (i32, i32) {
    %c0_i32 = arith.constant 0 : i32
    %c0_i32_0 = arith.constant 0 : i32
    return %arg0, %c0_i32 : i32, i32
  }
  func.func @transform_3(%arg0: i32) -> (i32, i32) {
    %c0_i32 = arith.constant 0 : i32
    %c0_i32_0 = arith.constant 0 : i32
    return %arg0, %c0_i32 : i32, i32
  }
}

</mosaic_0001>

<bundles_post_ra>
// kernel: tpu_custom_call.1
= control target key start
LH: loop header
LB: loop body
LE: loop exit
PB: predicated region body
PF: predicated region fallthrough
CT: control target
= control target key end

     0   :  { %v126_v2 = vmov 0   ;;  %s189_s0 = inlined_call_operand.vmem [shape: f32[24,256], index: 0, kind: input, shape index: {}]   ;;  %s190_s1 = inlined_call_operand.vmem [shape: f32[24,1], index: 1, kind: input, shape index: {}]   ;;  %s191_s2 = inlined_call_operand.vmem [shape: f32[24,1], index: 2, kind: input, shape index: {}]   ;;  %s192_s3 = inlined_call_operand.hbm [shape: f32[24,256], index: 3, kind: output, shape index: {}]  }
   0x1   :  { %v23_v0 = vld [vmem:[%s191_s2 + $0x10] sm:$0xff]  ;;  %v21_v1 = vld [vmem:[%s191_s2] sm:$0xff]  ;;  %98 = vset.pattern.permute.xlu1 %v126_v2  ;;  %97 = vset.pattern.permute.xlu0 %v126_v2  ;;  %v46_v3 = vld [vmem:[%s190_s1 + $0x8] sm:$0xff] }
   0x2   :  { %36 = vperm.xlu1 %98, %v23_v0   ;;  %26 = vperm.xlu0 %97, %v21_v1  }
   0x3   :  { %8 = vsyncpa [#allocation3], 0  ;;  %99 = vset.pattern.permute.xlu2 %v126_v2  ;;  %v45_v4 = vld [vmem:[%s190_s1] sm:$0xff]  ;;  %v22_v5 = vld [vmem:[%s191_s2 + $0x8] sm:$0xff]  ;;  %s127_s7 = smov [#allocation2]   ;;  %s81_s11 = sshll.u32 %s192_s3, 4  ;;  %s82_s11 = int_to_ptr.hbm [resolvable:$true] %s81_s11 }
   0x4   :  { %55 = vperm.xlu2 %99, %v46_v3   ;;  %v47_v6 = vld [vmem:[%s190_s1 + $0x10] sm:$0xff]  ;;  %v19_v8 = vld [vmem:[%s189_s0 + $0x20] sm:$0xff]  ;;  %v20_v9 = vld [vmem:[%s189_s0 + $0x28] sm:$0xff]  ;;  %s79_s8 = sshll.u32 %s127_s7, 4  ;;  %s129_s12 = smov 16   ;;  %s80_s8 = int_to_ptr.vmem [resolvable:$true] %s79_s8 }
   0x5   :  { %v15_v17 = vld [vmem:[%s189_s0] sm:$0xff]  ;;  %v16_v18 = vld [vmem:[%s189_s0 + $0x8] sm:$0xff]  ;;  %v17_v19 = vld [vmem:[%s189_s0 + $0x10] sm:$0xff] }
   0x6   :  { %v18_v20 = vld [vmem:[%s189_s0 + $0x18] sm:$0xff]  ;;  %s128_s0 = smov 256  }
   0xa   :  { %50 = vperm.xlu1 %98, %v45_v4   ;;  %31 = vperm.xlu0 %97, %v22_v5  }
   0xc   :  { %60 = vperm.xlu2 %99, %v47_v6  }
  0x5e   :  { %v56_v7 = vpop.permute.xlu2 %55 }
  0x66   :  { %v61_v10 = vpop.permute.xlu2 %60 }
  0x74   :  { %v37_v11 = vpop.permute.xlu1 %36  ;;  %v27_v12 = vpop.permute.xlu0 %26 }
  0x75   :  { %v43_v13 = vmul.f32 %v37_v11, %v19_v8  ;;  %v44_v14 = vmul.f32 %v37_v11, %v20_v9  ;;  %v39_v21 = vmul.f32 %v27_v12, %v15_v17  ;;  %v40_v22 = vmul.f32 %v27_v12, %v16_v18 }
  0x77   :  { %v67_v15 = vadd.f32 %v61_v10, %v43_v13  ;;  %v68_v16 = vadd.f32 %v61_v10, %v44_v14 }
  0x79   :  { %73 = vst [vmem:[#allocation2 + $0x20] sm:$0xff] %v67_v15 }
  0x7a   :  { %74 = vst [vmem:[#allocation2 + $0x28] sm:$0xff] %v68_v16 }
  0x7c   :  { %v51_v23 = vpop.permute.xlu1 %50  ;;  %v32_v24 = vpop.permute.xlu0 %31 }
  0x7d   :  { %v63_v25 = vadd.f32 %v51_v23, %v39_v21  ;;  %v64_v26 = vadd.f32 %v51_v23, %v40_v22  ;;  %v41_v27 = vmul.f32 %v32_v24, %v17_v19  ;;  %v42_v28 = vmul.f32 %v32_v24, %v18_v20 }
  0x7f   :  { %69 = vst [vmem:[#allocation2] sm:$0xff] %v63_v25  ;;  %v65_v29 = vadd.f32 %v56_v7, %v41_v27  ;;  %v66_v30 = vadd.f32 %v56_v7, %v42_v28 }
  0x80   :  { %70 = vst [vmem:[#allocation2 + $0x8] sm:$0xff] %v64_v26 }
  0x81   :  { %71 = vst [vmem:[#allocation2 + $0x10] sm:$0xff] %v65_v29 }
  0x82   :  { %72 = vst [vmem:[#allocation2 + $0x18] sm:$0xff] %v66_v30 }
  0x83   :  { %87 = dma.vmem_to_hbm [thread:$0]  %s80_s8, 768, %s82_s11, [#allocation3], %s128_s0, %s128_s0, %s129_s12  }
  0x84   :  { %124 = dma.done.wait [#allocation3], 768  }
  0x85   :  { %125 = vsyncadd [#allocation3], 4294966528 }
  0x86   :  { %92 = vsyncpa [#allocation3], 1 }

</bundles_post_ra>
